<compile_context>
chip_gen: v6e
topology: v6e:2x2x1
jax: 0.10.0
libtpu: 0.0.40
codegen_flags: <defaults>
</compile_context>

<pallas_src>
import functools

import jax
import jax.numpy as jnp
from jax import lax
from jax.experimental import pallas as pl
from jax.experimental.pallas import tpu as pltpu


def _round_up(x, m):
    return ((x + m - 1) // m) * m


# ----------------------------------------------------------------------------
# Pallas kernels
# ----------------------------------------------------------------------------
def _project_kernel(x_ref, w_ref, b_ref, o_ref):
    """out[r, i-tile] = X[i-tile] @ W[r]  (+ bias when r is the root slot).

    Grid: (M tiles [parallel], R+1 [parallel]); relation axis innermost so the
    X row tile stays resident while the small weight blocks stream.
    """
    is_root = pl.program_id(1) == pl.num_programs(1) - 1
    acc = jnp.dot(x_ref[...], w_ref[0], preferred_element_type=jnp.float32)
    acc = acc + jnp.where(is_root, b_ref[...], jnp.zeros_like(b_ref[...]))
    o_ref[0] = acc.astype(o_ref.dtype)


def _rgcn_layer_kernel(a_ref, xw_ref, root_ref, *rest, apply_relu,
                       fuse_log_softmax, n_valid_cols):
    """out[i-tile] = root[i-tile] + sum_k A_flat[i-tile, k-tile] @ XW[k-tile].

    Grid: (M tiles [parallel], K tiles [arbitrary/reduction]).
    Accumulates in an f32 VMEM scratch; writes the output (bf16 or f32) plus
    the optional fused log-softmax only at the last k step.
    """
    acc_ref = rest[-1]
    out_refs = rest[:-1]
    k = pl.program_id(1)

    @pl.when(k == 0)
    def _init():
        acc_ref[...] = root_ref[...].astype(jnp.float32)

    acc_ref[...] += jnp.dot(a_ref[...], xw_ref[...],
                            preferred_element_type=jnp.float32)

    @pl.when(k == pl.num_programs(1) - 1)
    def _finalize():
        res = acc_ref[...]
        if apply_relu:
            res = jnp.maximum(res, 0.0)
        out_refs[0][...] = res.astype(out_refs[0].dtype)
        if fuse_log_softmax:
            col = lax.broadcasted_iota(jnp.int32, res.shape, 1)
            masked = jnp.where(col < n_valid_cols, res, jnp.float32(-1e30))
            m = jnp.max(masked, axis=1, keepdims=True)
            s = masked - m
            lse = jnp.log(jnp.sum(jnp.exp(s), axis=1, keepdims=True))
            out_refs[1][...] = s - lse


# ----------------------------------------------------------------------------
# Wrappers
# ----------------------------------------------------------------------------
def project_relations_and_root(x_p, w_all_p, bias_p, *, tm_p):
    """x_p: (Np, Fin_p) bf16, w_all_p: (R+1, Fin_p, Fout_p) bf16 (slot R = W_root),
    bias_p: (1, Fout_p) f32.  Returns (R+1, Np, Fout_p) bf16 where slot R holds
    X@W_root + bias."""
    Rp1, Fin_p, Fout_p = w_all_p.shape
    Np = x_p.shape[0]
    assert Np % tm_p == 0
    return pl.pallas_call(
        _project_kernel,
        out_shape=jax.ShapeDtypeStruct((Rp1, Np, Fout_p), jnp.bfloat16),
        grid_spec=pltpu.PrefetchScalarGridSpec(
            num_scalar_prefetch=0,
            grid=(Np // tm_p, Rp1),
            in_specs=[
                pl.BlockSpec((tm_p, Fin_p), lambda i, r: (i, 0)),        # X rows
                pl.BlockSpec((1, Fin_p, Fout_p), lambda i, r: (r, 0, 0)),  # W[r]
                pl.BlockSpec((1, Fout_p), lambda i, r: (0, 0)),          # bias
            ],
            out_specs=pl.BlockSpec((1, tm_p, Fout_p), lambda i, r: (r, i, 0)),
        ),
        compiler_params=pltpu.CompilerParams(
            dimension_semantics=("parallel", "parallel")),
    )(x_p, w_all_p, bias_p)


def rgcn_layer(a_flat, xw_stack, root, *, tm, tk, out_dtype,
               apply_relu=False, fuse_log_softmax=False, n_valid_cols=0):
    """a_flat: (Np, Kp) bf16, xw_stack: (Kp, Fout_p) bf16,
    root: (Np, Fout_p) bf16 (already includes X@W_root + bias).
    Returns tuple of 1 (out) or 2 (out, log_probs) arrays of shape (Np, Fout_p)."""
    Np, Kp = a_flat.shape
    Fout_p = xw_stack.shape[1]
    assert Np % tm == 0 and Kp % tk == 0

    kernel = functools.partial(
        _rgcn_layer_kernel, apply_relu=apply_relu,
        fuse_log_softmax=fuse_log_softmax, n_valid_cols=n_valid_cols)

    n_out = 2 if fuse_log_softmax else 1
    out_dtypes = (out_dtype, jnp.float32)[:n_out]
    out_shape = tuple(jax.ShapeDtypeStruct((Np, Fout_p), d) for d in out_dtypes)
    out_specs = tuple(pl.BlockSpec((tm, Fout_p), lambda i, k: (i, 0))
                      for _ in range(n_out))

    return pl.pallas_call(
        kernel,
        out_shape=out_shape,
        grid_spec=pltpu.PrefetchScalarGridSpec(
            num_scalar_prefetch=0,
            grid=(Np // tm, Kp // tk),
            in_specs=[
                pl.BlockSpec((tm, tk), lambda i, k: (i, k)),         # A tile
                pl.BlockSpec((tk, Fout_p), lambda i, k: (k, 0)),     # stacked XW
                pl.BlockSpec((tm, Fout_p), lambda i, k: (i, 0)),     # root (resident)
            ],
            out_specs=out_specs,
            scratch_shapes=[pltpu.VMEM((tm, Fout_p), jnp.float32)],
        ),
        compiler_params=pltpu.CompilerParams(
            dimension_semantics=("parallel", "arbitrary")),
    )(a_flat, xw_stack, root)


def _pad_2d(a, d0, d1):
    return jnp.zeros((d0, d1), a.dtype).at[:a.shape[0], :a.shape[1]].set(a)


def _pad_3d(a, d0, d1, d2):
    return jnp.zeros((d0, d1, d2), a.dtype).at[
        :a.shape[0], :a.shape[1], :a.shape[2]].set(a)


def wrgcn_forward(params, x, edge_index, edge_weight, edge_color,
                  num_relations):
    N, Fin = x.shape
    H = params["w1_root"].shape[1]
    C = params["w2_root"].shape[1]
    R = max(int(num_relations), 1)   # guard the num_relations == 0 edge case

    LANE = 128
    # Row tile: as large as possible (cap 512) while keeping >= 2 M tiles so a
    # v7x megacore gets both TensorCores busy; floor 16 keeps bf16 blocks
    # sublane-tile aligned.  Layer 2 (fused log-softmax) caps at 256 so the
    # finalize's f32 temporaries stay spill-free.
    tm1 = 512
    while tm1 > 16 and _round_up(N, tm1) // tm1 < 2:
        tm1 //= 2
    Np = _round_up(N, tm1)
    tm2 = min(256, tm1)
    tm_p = tm1

    Fin_p = _round_up(Fin, LANE)
    H_p = _round_up(H, LANE)
    C_p = _round_up(C, LANE)

    k_raw = R * Np
    tk = min(2048, _round_up(k_raw, LANE))   # lane-dense K tiles (multiple of 128)
    Kp = _round_up(k_raw, tk)

    # glue: dense flattened weighted adjacency  A_flat[dst, r*Np + src],
    # built directly in the kernel's operand dtype (bf16) — no f32 round trip.
    # (Duplicate edges accumulate in bf16; acceptable at this tolerance.)
    src = edge_index[0].astype(jnp.int32)
    dst = edge_index[1].astype(jnp.int32)
    cols = edge_color.astype(jnp.int32) * Np + src
    a_flat = jnp.zeros((Np, Kp), jnp.bfloat16)
    a_flat = a_flat.at[dst, cols].add(edge_weight.astype(jnp.bfloat16))
    # TODO(synk): replace this dense O(R*N^2) A stream with scalar-prefetch
    # driven block-sparse aggregation (traffic ~ nnz) for realistic graphs.

    # padded / bf16 operands (padding rows/cols are zero => no contribution)
    x_p = _pad_2d(x, Np, Fin_p).astype(jnp.bfloat16)
    w1_all = jnp.concatenate(
        [_pad_3d(params["w1_rel"], R, Fin_p, H_p),
         _pad_2d(params["w1_root"], Fin_p, H_p)[None]],
        axis=0).astype(jnp.bfloat16)
    b1_p = _pad_2d(params["b1"].reshape(1, -1), 1, H_p)
    w2_all = jnp.concatenate(
        [_pad_3d(params["w2_rel"], R, H_p, C_p),
         _pad_2d(params["w2_root"], H_p, C_p)[None]],
        axis=0).astype(jnp.bfloat16)
    b2_p = _pad_2d(params["b2"].reshape(1, -1), 1, C_p)

    def _split(xw_all):
        root = xw_all[R]                                  # (Np, Fout_p)
        xw = xw_all[:R].reshape(R * Np, xw_all.shape[-1])  # (R*Np, Fout_p)
        if Kp > k_raw:
            xw = jnp.pad(xw, ((0, Kp - k_raw), (0, 0)))
        return xw, root

    # layer 1: relu(root + sum_r A_r @ (X @ W_r)); dropout(p=0) == identity.
    # Emits bf16 directly (fused cast) to feed layer 2.
    xw1, root1 = _split(project_relations_and_root(x_p, w1_all, b1_p, tm_p=tm_p))
    h_bf = rgcn_layer(a_flat, xw1, root1, tm=tm1, tk=tk,
                      out_dtype=jnp.bfloat16, apply_relu=True)[0]

    # layer 2 (+ fused log_softmax over the valid class columns)
    xw2, root2 = _split(project_relations_and_root(h_bf, w2_all, b2_p, tm_p=tm_p))
    logits_p, logp_p = rgcn_layer(a_flat, xw2, root2, tm=tm2, tk=tk,
                                  out_dtype=jnp.float32, apply_relu=False,
                                  fuse_log_softmax=True, n_valid_cols=C)
    return logp_p[:N, :C], logits_p[:N, :C]


# ----------------------------------------------------------------------------
# Pure-JAX reference (f32) and params
# ----------------------------------------------------------------------------
def wrgcn_reference(params, x, edge_index, edge_weight, edge_color,
                    num_relations):
    N = x.shape[0]
    src, dst = edge_index[0], edge_index[1]
    A = jnp.zeros((num_relations, N, N), jnp.float32)
    A = A.at[edge_color, dst, src].add(edge_weight.astype(jnp.float32))

    def layer(h, w_rel, w_root, b):
        hw = jnp.einsum("nf,rfo->rno", h, w_rel)
        agg = jnp.einsum("rmn,rno->mo", A, hw)
        return h @ w_root + b + agg

    h1 = jax.nn.relu(layer(x, params["w1_rel"], params["w1_root"],
                           params["b1"]))
    logits = layer(h1, params["w2_rel"], params["w2_root"], params["b2"])
    return jax.nn.log_softmax(logits, axis=1), logits


def init_params(key, num_features, num_classes, num_relations, dims):
    ks = jax.random.split(key, 4)
    scale1 = 1.0 / jnp.sqrt(num_features)
    scale2 = 1.0 / jnp.sqrt(dims)
    return {
        "w1_rel": jax.random.normal(ks[0], (num_relations, num_features, dims),
                                    jnp.float32) * scale1,
        "w1_root": jax.random.normal(ks[1], (num_features, dims),
                                     jnp.float32) * scale1,
        "b1": jnp.zeros((dims,), jnp.float32),
        "w2_rel": jax.random.normal(ks[2], (num_relations, dims, num_classes),
                                    jnp.float32) * scale2,
        "w2_root": jax.random.normal(ks[3], (dims, num_classes),
                                     jnp.float32) * scale2,
        "b2": jnp.zeros((num_classes,), jnp.float32),
    }


if __name__ == "__main__":
    num_nodes = 16
    num_features = 8
    num_classes = 4
    num_relations = 3
    dims = 16
    num_edges = 40

    key = jax.random.PRNGKey(0)
    k_x, k_e, k_w, k_c, k_p = jax.random.split(key, 5)

    x = jax.random.normal(k_x, (num_nodes, num_features), jnp.float32)
    edge_index = jax.random.randint(k_e, (2, num_edges), 0, num_nodes,
                                    dtype=jnp.int32)
    edge_weight = jax.random.uniform(k_w, (num_edges,), jnp.float32)
    edge_color = jax.random.randint(k_c, (num_edges,), 0, num_relations,
                                    dtype=jnp.int32)

    params = init_params(k_p, num_features, num_classes, num_relations, dims)

    fwd = jax.jit(functools.partial(wrgcn_forward,
                                    num_relations=num_relations))
    log_probs, logits = fwd(params, x, edge_index, edge_weight, edge_color)
    jax.block_until_ready((log_probs, logits))

    assert log_probs.shape == (num_nodes, num_classes)
    assert logits.shape == (num_nodes, num_classes)

    # rows of exp(log_probs) must sum to 1
    row_sums = jnp.sum(jnp.exp(log_probs), axis=1)
    assert bool(jnp.all(jnp.abs(row_sums - 1.0) < 1e-4))

    # compare against pure-JAX f32 reference (loose tolerance: bf16 matmuls)
    ref_logp, ref_logits = wrgcn_reference(params, x, edge_index, edge_weight,
                                           edge_color, num_relations)
    assert bool(jnp.max(jnp.abs(logits - ref_logits)) < 0.3)
    assert bool(jnp.max(jnp.abs(log_probs - ref_logp)) < 0.3)

    print("KERNEL_OK")
</pallas_src>

<mosaic_0001>
module attributes {stable_mosaic.version = 11 : i64} {
  func.func @_project_kernel(%arg0: i32, %arg1: i32, %arg2: memref<16x128xbf16, #tpu.memory_space<vmem>>, %arg3: memref<1x128x128xbf16, #tpu.memory_space<vmem>>, %arg4: memref<1x128xf32, #tpu.memory_space<vmem>>, %arg5: memref<1x16x128xbf16, #tpu.memory_space<vmem>>) attributes {dimension_semantics = [#tpu.dimension_semantics<parallel>, #tpu.dimension_semantics<parallel>], iteration_bounds = array<i64: 1, 4>, scalar_prefetch = 0 : i64, scratch_operands = 0 : i64, tpu.core_type = #tpu.core_type<tc>, window_params = [{transform_indices = @transform_0, window_bounds = array<i64: 16, 128>}, {transform_indices = @transform_1, window_bounds = array<i64: 1, 128, 128>}, {pipeline_mode = #tpu.pipeline_mode<synchronous>, transform_indices = @transform_2, window_bounds = array<i64: 1, 128>}, {transform_indices = @transform_3, window_bounds = array<i64: 1, 16, 128>}]} {
    %c3_i32 = arith.constant 3 : i32
    %0 = arith.cmpi eq, %arg1, %c3_i32 : i32
    %c0 = arith.constant 0 : index
    %c0_0 = arith.constant 0 : index
    %1 = vector.load %arg2[%c0, %c0_0] : memref<16x128xbf16, #tpu.memory_space<vmem>>, vector<16x128xbf16>
    %c0_1 = arith.constant 0 : index
    %c0_2 = arith.constant 0 : index
    %c0_3 = arith.constant 0 : index
    %2 = vector.load %arg3[%c0_1, %c0_2, %c0_3] : memref<1x128x128xbf16, #tpu.memory_space<vmem>>, vector<1x128x128xbf16>
    %3 = vector.shape_cast %2 : vector<1x128x128xbf16> to vector<128x128xbf16>
    %cst = arith.constant dense<0.000000e+00> : vector<16x128xf32>
    %4 = tpu.matmul %1, %3, %cst {dimension_numbers = #tpu.dot_dimension_numbers<[1], [0], [0], [1], [0, 0, 1, 1], [], []>} : vector<16x128xbf16>, vector<128x128xbf16>, vector<16x128xf32> -> vector<16x128xf32>
    %c0_4 = arith.constant 0 : index
    %c0_5 = arith.constant 0 : index
    %5 = vector.load %arg4[%c0_4, %c0_5] : memref<1x128xf32, #tpu.memory_space<vmem>>, vector<1x128xf32>
    %cst_6 = arith.constant 0.000000e+00 : f32
    %6 = vector.broadcast %cst_6 : f32 to vector<1x128xf32>
    %7 = arith.select %0, %5, %6 : vector<1x128xf32>
    %8 = vector.broadcast %7 : vector<1x128xf32> to vector<16x128xf32>
    %9 = arith.addf %4, %8 : vector<16x128xf32>
    %10 = arith.truncf %9 : vector<16x128xf32> to vector<16x128xbf16>
    %c0_7 = arith.constant 0 : index
    %c0_8 = arith.constant 0 : index
    %c0_9 = arith.constant 0 : index
    %11 = vector.load %arg5[%c0_7, %c0_8, %c0_9] : memref<1x16x128xbf16, #tpu.memory_space<vmem>>, vector<1x16x128xbf16>
    %12 = vector.shape_cast %11 : vector<1x16x128xbf16> to vector<16x128xbf16>
    %13 = vector.shape_cast %10 : vector<16x128xbf16> to vector<1x16x128xbf16>
    tpu.vector_store %arg5[%c0_7, %c0_8, %c0_9], %13 {strides = array<i32>} : memref<1x16x128xbf16, #tpu.memory_space<vmem>>, vector<1x16x128xbf16>,
    return
  }
  func.func @transform_0(%arg0: i32, %arg1: i32) -> (i32, i32) {
    %c0_i32 = arith.constant 0 : i32
    %c0_i32_0 = arith.constant 0 : i32
    return %arg0, %c0_i32 : i32, i32
  }
  func.func @transform_1(%arg0: i32, %arg1: i32) -> (i32, i32, i32) {
    %c0_i32 = arith.constant 0 : i32
    %c0_i32_0 = arith.constant 0 : i32
    %c0_i32_1 = arith.constant 0 : i32
    return %arg1, %c0_i32, %c0_i32_0 : i32, i32, i32
  }
  func.func @transform_2(%arg0: i32, %arg1: i32) -> (i32, i32) {
    %c0_i32 = arith.constant 0 : i32
    %c0_i32_0 = arith.constant 0 : i32
    %c0_i32_1 = arith.constant 0 : i32
    return %c0_i32, %c0_i32_0 : i32, i32
  }
  func.func @transform_3(%arg0: i32, %arg1: i32) -> (i32, i32, i32) {
    %c0_i32 = arith.constant 0 : i32
    %c0_i32_0 = arith.constant 0 : i32
    return %arg1, %arg0, %c0_i32 : i32, i32, i32
  }
}

module attributes {stable_mosaic.version = 11 : i64} {
  func.func @_rgcn_layer_kernel(%arg0: i32, %arg1: i32, %arg2: memref<16x128xbf16, #tpu.memory_space<vmem>>, %arg3: memref<128x128xbf16, #tpu.memory_space<vmem>>, %arg4: memref<16x128xbf16, #tpu.memory_space<vmem>>, %arg5: memref<16x128xbf16, #tpu.memory_space<vmem>>, %arg6: memref<16x128xf32, #tpu.memory_space<vmem>>) attributes {dimension_semantics = [#tpu.dimension_semantics<parallel>, #tpu.dimension_semantics<arbitrary>], iteration_bounds = array<i64: 1, 1>, scalar_prefetch = 0 : i64, scratch_operands = 1 : i64, tpu.core_type = #tpu.core_type<tc>, window_params = [{transform_indices = @transform_0, window_bounds = array<i64: 16, 128>}, {transform_indices = @transform_1, window_bounds = array<i64: 128, 128>}, {transform_indices = @transform_2, window_bounds = array<i64: 16, 128>}, {transform_indices = @transform_3, window_bounds = array<i64: 16, 128>}]} {
    %c0_i32 = arith.constant 0 : i32
    %0 = arith.cmpi eq, %arg1, %c0_i32 : i32
    %1 = arith.extui %0 : i1 to i32
    %c0_i32_0 = arith.constant 0 : i32
    %2 = arith.cmpi ne, %1, %c0_i32_0 : i32
    scf.if %2 {
      %c0_10 = arith.constant 0 : index
      %c0_11 = arith.constant 0 : index
      %12 = vector.load %arg4[%c0_10, %c0_11] : memref<16x128xbf16, #tpu.memory_space<vmem>>, vector<16x128xbf16>
      %13 = arith.extf %12 : vector<16x128xbf16> to vector<16x128xf32>
      %c0_12 = arith.constant 0 : index
      %c0_13 = arith.constant 0 : index
      %14 = vector.load %arg6[%c0_12, %c0_13] : memref<16x128xf32, #tpu.memory_space<vmem>>, vector<16x128xf32>
      tpu.vector_store %arg6[%c0_12, %c0_13], %13 {strides = array<i32>} : memref<16x128xf32, #tpu.memory_space<vmem>>, vector<16x128xf32>,
    } else {
    }
    %c0 = arith.constant 0 : index
    %c0_1 = arith.constant 0 : index
    %3 = vector.load %arg6[%c0, %c0_1] : memref<16x128xf32, #tpu.memory_space<vmem>>, vector<16x128xf32>
    %c0_2 = arith.constant 0 : index
    %c0_3 = arith.constant 0 : index
    %4 = vector.load %arg2[%c0_2, %c0_3] : memref<16x128xbf16, #tpu.memory_space<vmem>>, vector<16x128xbf16>
    %c0_4 = arith.constant 0 : index
    %c0_5 = arith.constant 0 : index
    %5 = vector.load %arg3[%c0_4, %c0_5] : memref<128x128xbf16, #tpu.memory_space<vmem>>, vector<128x128xbf16>
    %cst = arith.constant dense<0.000000e+00> : vector<16x128xf32>
    %6 = tpu.matmul %4, %5, %cst {dimension_numbers = #tpu.dot_dimension_numbers<[1], [0], [0], [1], [0, 0, 1, 1], [], []>} : vector<16x128xbf16>, vector<128x128xbf16>, vector<16x128xf32> -> vector<16x128xf32>
    %7 = arith.addf %3, %6 : vector<16x128xf32>
    %c0_6 = arith.constant 0 : index
    %c0_7 = arith.constant 0 : index
    %8 = vector.load %arg6[%c0_6, %c0_7] : memref<16x128xf32, #tpu.memory_space<vmem>>, vector<16x128xf32>
    tpu.vector_store %arg6[%c0_6, %c0_7], %7 {strides = array<i32>} : memref<16x128xf32, #tpu.memory_space<vmem>>, vector<16x128xf32>,
    %c0_i32_8 = arith.constant 0 : i32
    %9 = arith.cmpi eq, %arg1, %c0_i32_8 : i32
    %10 = arith.extui %9 : i1 to i32
    %c0_i32_9 = arith.constant 0 : i32
    %11 = arith.cmpi ne, %10, %c0_i32_9 : i32
    scf.if %11 {
      %c0_10 = arith.constant 0 : index
      %c0_11 = arith.constant 0 : index
      %12 = vector.load %arg6[%c0_10, %c0_11] : memref<16x128xf32, #tpu.memory_space<vmem>>, vector<16x128xf32>
      %cst_12 = arith.constant 0.000000e+00 : f32
      %13 = vector.broadcast %cst_12 : f32 to vector<16x128xf32>
      %14 = arith.maximumf %12, %13 : vector<16x128xf32>
      %15 = arith.truncf %14 : vector<16x128xf32> to vector<16x128xbf16>
      %c0_13 = arith.constant 0 : index
      %c0_14 = arith.constant 0 : index
      %16 = vector.load %arg5[%c0_13, %c0_14] : memref<16x128xbf16, #tpu.memory_space<vmem>>, vector<16x128xbf16>
      tpu.vector_store %arg5[%c0_13, %c0_14], %15 {strides = array<i32>} : memref<16x128xbf16, #tpu.memory_space<vmem>>, vector<16x128xbf16>,
    } else {
    }
    return
  }
  func.func @transform_0(%arg0: i32, %arg1: i32) -> (i32, i32) {
    %c0_i32 = arith.constant 0 : i32
    return %arg0, %arg1 : i32, i32
  }
  func.func @transform_1(%arg0: i32, %arg1: i32) -> (i32, i32) {
    %c0_i32 = arith.constant 0 : i32
    %c0_i32_0 = arith.constant 0 : i32
    return %arg1, %c0_i32 : i32, i32
  }
  func.func @transform_2(%arg0: i32, %arg1: i32) -> (i32, i32) {
    %c0_i32 = arith.constant 0 : i32
    %c0_i32_0 = arith.constant 0 : i32
    return %arg0, %c0_i32 : i32, i32
  }
  func.func @transform_3(%arg0: i32, %arg1: i32) -> (i32, i32) {
    %c0_i32 = arith.constant 0 : i32
    %c0_i32_0 = arith.constant 0 : i32
    return %arg0, %c0_i32 : i32, i32
  }
}

module attributes {stable_mosaic.version = 11 : i64} {
  func.func @_rgcn_layer_kernel(%arg0: i32, %arg1: i32, %arg2: memref<16x128xbf16, #tpu.memory_space<vmem>>, %arg3: memref<128x128xbf16, #tpu.memory_space<vmem>>, %arg4: memref<16x128xbf16, #tpu.memory_space<vmem>>, %arg5: memref<16x128xf32, #tpu.memory_space<vmem>>, %arg6: memref<16x128xf32, #tpu.memory_space<vmem>>, %arg7: memref<16x128xf32, #tpu.memory_space<vmem>>) attributes {dimension_semantics = [#tpu.dimension_semantics<parallel>, #tpu.dimension_semantics<arbitrary>], iteration_bounds = array<i64: 1, 1>, scalar_prefetch = 0 : i64, scratch_operands = 1 : i64, tpu.core_type = #tpu.core_type<tc>, window_params = [{transform_indices = @transform_0, window_bounds = array<i64: 16, 128>}, {transform_indices = @transform_1, window_bounds = array<i64: 128, 128>}, {transform_indices = @transform_2, window_bounds = array<i64: 16, 128>}, {transform_indices = @transform_3, window_bounds = array<i64: 16, 128>}, {transform_indices = @transform_4, window_bounds = array<i64: 16, 128>}]} {
    %c0_i32 = arith.constant 0 : i32
    %0 = arith.cmpi eq, %arg1, %c0_i32 : i32
    %1 = arith.extui %0 : i1 to i32
    %c0_i32_0 = arith.constant 0 : i32
    %2 = arith.cmpi ne, %1, %c0_i32_0 : i32
    scf.if %2 {
      %c0_10 = arith.constant 0 : index
      %c0_11 = arith.constant 0 : index
      %12 = vector.load %arg4[%c0_10, %c0_11] : memref<16x128xbf16, #tpu.memory_space<vmem>>, vector<16x128xbf16>
      %13 = arith.extf %12 : vector<16x128xbf16> to vector<16x128xf32>
      %c0_12 = arith.constant 0 : index
      %c0_13 = arith.constant 0 : index
      %14 = vector.load %arg7[%c0_12, %c0_13] : memref<16x128xf32, #tpu.memory_space<vmem>>, vector<16x128xf32>
      tpu.vector_store %arg7[%c0_12, %c0_13], %13 {strides = array<i32>} : memref<16x128xf32, #tpu.memory_space<vmem>>, vector<16x128xf32>,
    } else {
    }
    %c0 = arith.constant 0 : index
    %c0_1 = arith.constant 0 : index
    %3 = vector.load %arg7[%c0, %c0_1] : memref<16x128xf32, #tpu.memory_space<vmem>>, vector<16x128xf32>
    %c0_2 = arith.constant 0 : index
    %c0_3 = arith.constant 0 : index
    %4 = vector.load %arg2[%c0_2, %c0_3] : memref<16x128xbf16, #tpu.memory_space<vmem>>, vector<16x128xbf16>
    %c0_4 = arith.constant 0 : index
    %c0_5 = arith.constant 0 : index
    %5 = vector.load %arg3[%c0_4, %c0_5] : memref<128x128xbf16, #tpu.memory_space<vmem>>, vector<128x128xbf16>
    %cst = arith.constant dense<0.000000e+00> : vector<16x128xf32>
    %6 = tpu.matmul %4, %5, %cst {dimension_numbers = #tpu.dot_dimension_numbers<[1], [0], [0], [1], [0, 0, 1, 1], [], []>} : vector<16x128xbf16>, vector<128x128xbf16>, vector<16x128xf32> -> vector<16x128xf32>
    %7 = arith.addf %3, %6 : vector<16x128xf32>
    %c0_6 = arith.constant 0 : index
    %c0_7 = arith.constant 0 : index
    %8 = vector.load %arg7[%c0_6, %c0_7] : memref<16x128xf32, #tpu.memory_space<vmem>>, vector<16x128xf32>
    tpu.vector_store %arg7[%c0_6, %c0_7], %7 {strides = array<i32>} : memref<16x128xf32, #tpu.memory_space<vmem>>, vector<16x128xf32>,
    %c0_i32_8 = arith.constant 0 : i32
    %9 = arith.cmpi eq, %arg1, %c0_i32_8 : i32
    %10 = arith.extui %9 : i1 to i32
    %c0_i32_9 = arith.constant 0 : i32
    %11 = arith.cmpi ne, %10, %c0_i32_9 : i32
    scf.if %11 {
      %c0_10 = arith.constant 0 : index
      %c0_11 = arith.constant 0 : index
      %12 = vector.load %arg7[%c0_10, %c0_11] : memref<16x128xf32, #tpu.memory_space<vmem>>, vector<16x128xf32>
      %c0_12 = arith.constant 0 : index
      %c0_13 = arith.constant 0 : index
      %13 = vector.load %arg5[%c0_12, %c0_13] : memref<16x128xf32, #tpu.memory_space<vmem>>, vector<16x128xf32>
      tpu.vector_store %arg5[%c0_12, %c0_13], %12 {strides = array<i32>} : memref<16x128xf32, #tpu.memory_space<vmem>>, vector<16x128xf32>,
      %14 = tpu.iota {dimensions = array<i32: 1>} : vector<16x128xi32>
      %c4_i32 = arith.constant 4 : i32
      %15 = vector.broadcast %c4_i32 : i32 to vector<16x128xi32>
      %16 = arith.cmpi slt, %14, %15 : vector<16x128xi32>
      %cst_14 = arith.constant -1.000000e+30 : f32
      %17 = vector.broadcast %cst_14 : f32 to vector<16x128xf32>
      %18 = arith.select %16, %12, %17 : vector<16x128xi1>, vector<16x128xf32>
      %cst_15 = arith.constant dense<0xFF800000> : vector<16xf32>
      %19 = vector.multi_reduction <maximumf>, %18, %cst_15 [1] : vector<16x128xf32> to vector<16xf32>
      %20 = vector.shape_cast %19 : vector<16xf32> to vector<16x1xf32>
      %21 = vector.broadcast %20 : vector<16x1xf32> to vector<16x128xf32>
      %22 = arith.subf %18, %21 : vector<16x128xf32>
      %23 = math.exp %22 : vector<16x128xf32>
      %cst_16 = arith.constant dense<0.000000e+00> : vector<16xf32>
      %24 = vector.multi_reduction <add>, %23, %cst_16 [1] : vector<16x128xf32> to vector<16xf32>
      %25 = vector.shape_cast %24 : vector<16xf32> to vector<16x1xf32>
      %26 = math.log %25 : vector<16x1xf32>
      %27 = vector.broadcast %26 : vector<16x1xf32> to vector<16x128xf32>
      %28 = arith.subf %22, %27 : vector<16x128xf32>
      %c0_17 = arith.constant 0 : index
      %c0_18 = arith.constant 0 : index
      %29 = vector.load %arg6[%c0_17, %c0_18] : memref<16x128xf32, #tpu.memory_space<vmem>>, vector<16x128xf32>
      tpu.vector_store %arg6[%c0_17, %c0_18], %28 {strides = array<i32>} : memref<16x128xf32, #tpu.memory_space<vmem>>, vector<16x128xf32>,
    } else {
    }
    return
  }
  func.func @transform_0(%arg0: i32, %arg1: i32) -> (i32, i32) {
    %c0_i32 = arith.constant 0 : i32
    return %arg0, %arg1 : i32, i32
  }
  func.func @transform_1(%arg0: i32, %arg1: i32) -> (i32, i32) {
    %c0_i32 = arith.constant 0 : i32
    %c0_i32_0 = arith.constant 0 : i32
    return %arg1, %c0_i32 : i32, i32
  }
  func.func @transform_2(%arg0: i32, %arg1: i32) -> (i32, i32) {
    %c0_i32 = arith.constant 0 : i32
    %c0_i32_0 = arith.constant 0 : i32
    return %arg0, %c0_i32 : i32, i32
  }
  func.func @transform_3(%arg0: i32, %arg1: i32) -> (i32, i32) {
    %c0_i32 = arith.constant 0 : i32
    %c0_i32_0 = arith.constant 0 : i32
    return %arg0, %c0_i32 : i32, i32
  }
  func.func @transform_4(%arg0: i32, %arg1: i32) -> (i32, i32) {
    %c0_i32 = arith.constant 0 : i32
    %c0_i32_0 = arith.constant 0 : i32
    return %arg0, %c0_i32 : i32, i32
  }
}

</mosaic_0001>

<bundles_post_ra>
// kernel: wrgcn_forward.5
= control target key start
LH: loop header
LB: loop body
LE: loop exit
PB: predicated region body
PF: predicated region fallthrough
CT: control target
= control target key end

     0   :  { %v227_v0 = vmov 0.0   ;;  %vm228_vm0 = vmmov 0   ;;  %s282_s1 = inlined_call_operand.vmem [shape: bf16[128,128], index: 1, kind: input, shape index: {}]   ;;  %s283_s0 = inlined_call_operand.vmem [shape: bf16[16,128], index: 0, kind: input, shape index: {}]   ;;  %s284_s2 = inlined_call_operand.vmem [shape: bf16[16,128], index: 2, kind: input, shape index: {}]   ;;  %s285_s3 = inlined_call_operand.vmem [shape: bf16[16,128], index: 3, kind: output, shape index: {}]  }
   0x1   :  { %196 = vmatprep.subr.bf16.mxu0 %v227_v0  ;;  %v218_v1 = vld [vmem:[%s282_s1 + $0x38] sm:$0xff]   ;;  %212 = vmatprep.mubr.msk.bf16.mxu0 %vm228_vm0, %v227_v0  ;;  %v219_v2 = vld [vmem:[%s282_s1 + $0x30] sm:$0xff]   ;;  %v220_v3 = vld [vmem:[%s282_s1 + $0x28] sm:$0xff]  }
   0x2   :  { %197 = vmatpush3.bf16.msra.mxu0 %v218_v1  ;;  %v221_v4 = vld [vmem:[%s282_s1 + $0x20] sm:$0xff]   ;;  %v222_v5 = vld [vmem:[%s282_s1 + $0x18] sm:$0xff]   ;;  %v223_v6 = vld [vmem:[%s282_s1 + $0x10] sm:$0xff]  }
   0x3   :  { %198 = vmatprep.subr.bf16.mxu0 %v227_v0  ;;  %v224_v7 = vld [vmem:[%s282_s1 + $0x8] sm:$0xff]   ;;  %v225_v8 = vld [vmem:[%s282_s1] sm:$0xff]  }
   0x4   :  { %v226_v9 = vld [vmem:[%s283_s0] sm:$0xff]  }
   0x5   :  { %v179_v10 = vld [vmem:[%s284_s2] sm:$0xff]  }
   0x6   :  { %199 = vmatpush3.bf16.msra.mxu0 %v219_v2  ;;  %v180_v11 = vunpack.c.l.bf16 %v179_v10  ;;  %v181_v13 = vunpack.c.h.bf16 %v179_v10 }
   0x7   :  { %200 = vmatprep.subr.bf16.mxu0 %v227_v0 }
   0xa   :  { %201 = vmatpush3.bf16.msra.mxu0 %v220_v3 }
   0xb   :  { %202 = vmatprep.subr.bf16.mxu0 %v227_v0 }
   0xe   :  { %203 = vmatpush3.bf16.msra.mxu0 %v221_v4 }
   0xf   :  { %204 = vmatprep.subr.bf16.mxu0 %v227_v0 }
  0x12   :  { %205 = vmatpush3.bf16.msra.mxu0 %v222_v5 }
  0x13   :  { %206 = vmatprep.subr.bf16.mxu0 %v227_v0 }
  0x16   :  { %207 = vmatpush3.bf16.msra.mxu0 %v223_v6 }
  0x17   :  { %208 = vmatprep.subr.bf16.mxu0 %v227_v0 }
  0x1a   :  { %209 = vmatpush3.bf16.msra.mxu0 %v224_v7 }
  0x1b   :  { %210 = vmatprep.subr.bf16.mxu0 %v227_v0 }
  0x1e   :  { %211 = vmatpush3.bf16.msra.mxu0 %v225_v8 }
  0x21   :  { %213 = vmatmul.mubr.bf16.vlgmr.msra.gmra.mxu0 %v226_v9 }
  0xe1   :  { %v133_v12 = vpop.f32.mrf.mxu0 }
  0xe2   :  { %v140_v15 = vadd.f32 %v180_v11, %v133_v12 }
  0xe3   :  { %v214_v14 = vpop.f32.mrf.mxu0 }
  0xe4   :  { %v149_v19 = vmax.f32 %v140_v15, 0.0 }
  0xe5   :  { %v136_v16 = vpop.f32.mrf.mxu0 }
  0xe6   :  { %v141_v17 = vadd.f32 %v181_v13, %v136_v16 }
  0xe7   :  { %v215_v18 = vpop.f32.mrf.mxu0 }
  0xe8   :  { %v150_v20 = vmax.f32 %v141_v17, 0.0 }
  0xea   :  { %v185_v21 = vpack.c.bf16 %v150_v20, %v149_v19 }
  0xec   :  { %186 = vst [vmem:[%s285_s3] sm:$0xff] %v185_v21  }

// kernel: wrgcn_forward.4
= control target key start
LH: loop header
LB: loop body
LE: loop exit
PB: predicated region body
PF: predicated region fallthrough
CT: control target
= control target key end

     0   :  { %s590_s12 = smov 0   ;;  %s592_s13 = smov 0   ;;  %s638_s0 = inlined_call_operand.vmem [shape: bf16[16,128], index: 0, kind: input, shape index: {}]   ;;  %s639_s1 = inlined_call_operand.vmem [shape: bf16[4,128,128], index: 1, kind: input, shape index: {}]   ;;  %s640_s2 = inlined_call_operand.vmem [shape: f32[1,128], index: 2, kind: input, shape index: {}]   ;;  %s641_s3 = inlined_call_operand.vmem [shape: bf16[4,16,128], index: 3, kind: output, shape index: {}]  }
   0x1   :  { %s594_s14 = smov 0  }
   0x2 LB: > { %s22_s15 = sadd.s32 1, %s562_s13  ;;  %p453_p0 = scmp.ge.s32.totalorder %s566_s14, 1  ;;  %s566_s14 = sphi %s594_s14, %s13_s14   ;;  %s562_s13 = sphi %s592_s13, %s643_s13   ;;  %s558_s12 = sphi %s590_s12, %s642_s12  }
   0x3   : > { %p23_p1 = scmp.ge.s32.totalorder %s22_s15, 4  ;;  %p162_p2 = scmp.lt.s32.totalorder %s566_s14, 5 }
   0x5   : > { %s645_s15 = smov (%p23_p1, %s22_s15), 0  ;;  %p163_p3 = pnand %p453_p0, %p162_p2 }
   0x6   : > { %p201_p4 = scmp.lt.s32.totalorder (!%p163_p3), %s558_s12, 3  ;;  %p217_p5 = scmp.eq.s32.totalorder (!%p163_p3), %s558_s12, 3 }
   0x7   : > { %166 = sbr.rel (%p163_p3) target bundleno = 250 (0xfa), region = 32 }
   0xc   : > { %v568_v0 = vmov 0.0   ;;  %vm569_vm0 = vmmov 0   ;;  %s612_s16 = scalar_select %p201_p4, %s558_s12, 3  ;;  %v543_v9 = vld [vmem:[%s638_s0] sm:$0xff]   ;;  %v242_v10 = vlaneseq }
   0xd   : > { %489 = vmatprep.subr.bf16.mxu0 %v568_v0  ;;  %505 = vmatprep.mubr.msk.bf16.mxu0 %vm569_vm0, %v568_v0  ;;  %s237_s23 = scalar_select %p217_p5, 1, 0  ;;  %v236_v13 = vld [vmem:[%s640_s2] sm:$0x1] }
   0xe   : > { %s471_s17 = sshll.u32 %s612_s16, 6  ;;  %v243_v12 = vshrl.u32 %v242_v10, 7  ;;  %s472_s26 = sshll.u32 %s612_s16, 3 }
   0xf   : > { %s205_s20 = scalar_lea.vmem %s639_s1, %s471_s17  ;;  %v238_v11 = vstv %s237_s23  ;;  %s214_s29 = scalar_lea.vmem %s641_s3, %s472_s26 }
  0x10   : > { %v535_v1 = vld [vmem:[%s205_s20 + $0x38] sm:$0xff]   ;;  %v536_v2 = vld [vmem:[%s205_s20 + $0x30] sm:$0xff]   ;;  %v537_v3 = vld [vmem:[%s205_s20 + $0x28] sm:$0xff]   ;;  %vm239_vm1 = vcmp.eq.s32.totalorder %v238_v11, 1  ;;  %v244_v14 = vsub.s32 0, %v243_v12 }
  0x11   : > { %490 = vmatpush3.bf16.msra.mxu0 %v535_v1  ;;  %v538_v4 = vld [vmem:[%s205_s20 + $0x20] sm:$0xff]   ;;  %v539_v5 = vld [vmem:[%s205_s20 + $0x18] sm:$0xff]   ;;  %v540_v6 = vld [vmem:[%s205_s20 + $0x10] sm:$0xff]   ;;  %v240_v15 = vsel %vm239_vm1, %v236_v13, 0.0 }
  0x12   : > { %491 = vmatprep.subr.bf16.mxu0 %v568_v0  ;;  %v541_v7 = vld [vmem:[%s205_s20 + $0x8] sm:$0xff]   ;;  %v542_v8 = vld [vmem:[%s205_s20] sm:$0xff]   ;;  %v245_v17 = vrot.slane %v240_v15, %v244_v14 }
  0x15   : > { %492 = vmatpush3.bf16.msra.mxu0 %v536_v2 }
  0x16   : > { %493 = vmatprep.subr.bf16.mxu0 %v568_v0 }
  0x19   : > { %494 = vmatpush3.bf16.msra.mxu0 %v537_v3 }
  0x1a   : > { %495 = vmatprep.subr.bf16.mxu0 %v568_v0 }
  0x1d   : > { %496 = vmatpush3.bf16.msra.mxu0 %v538_v4 }
  0x1e   : > { %497 = vmatprep.subr.bf16.mxu0 %v568_v0 }
  0x21   : > { %498 = vmatpush3.bf16.msra.mxu0 %v539_v5 }
  0x22   : > { %499 = vmatprep.subr.bf16.mxu0 %v568_v0 }
  0x25   : > { %500 = vmatpush3.bf16.msra.mxu0 %v540_v6 }
  0x26   : > { %501 = vmatprep.subr.bf16.mxu0 %v568_v0 }
  0x29   : > { %502 = vmatpush3.bf16.msra.mxu0 %v541_v7 }
  0x2a   : > { %503 = vmatprep.subr.bf16.mxu0 %v568_v0 }
  0x2d   : > { %504 = vmatpush3.bf16.msra.mxu0 %v542_v8 }
  0x30   : > { %506 = vmatmul.mubr.bf16.vlgmr.msra.gmra.mxu0 %v543_v9 }
  0xf0   : > { %v335_v16 = vpop.f32.mrf.mxu0 }
  0xf1   : > { %v336_v20 = vadd.f32 %v335_v16, %v245_v17 }
  0xf2   : > { %v507_v18 = vpop.f32.mrf.mxu0 }
  0xf4   : > { %v338_v19 = vpop.f32.mrf.mxu0 }
  0xf5   : > { %v339_v21 = vadd.f32 %v338_v19, %v245_v17 }
  0xf6   : > { %v508_v22 = vpop.f32.mrf.mxu0 }
  0xf7   : > { %v478_v23 = vpack.c.bf16 %v339_v21, %v336_v20 }
  0xf9   : > { %479 = vst [vmem:[%s214_s29] sm:$0xff] %v478_v23  }
  0xfa PF: > { %s13_s14 = sadd.s32 1, %s566_s14   ;;  %s642_s12 = smov %s562_s13 }
  0xfb   : > { %p10_p6 = scmp.ge.s32.totalorder %s13_s14, 6   ;;  %s643_s13 = smov %s645_s15 }
  0xfd   :  { %12 = sbr.rel (!%p10_p6) target bundleno = 2 (0x2), region = 65 }

// kernel: wrgcn_forward.7
= control target key start
LH: loop header
LB: loop body
LE: loop exit
PB: predicated region body
PF: predicated region fallthrough
CT: control target
= control target key end

     0   :  { %v249_v0 = vmov 0.0   ;;  %vm250_vm0 = vmmov 0   ;;  %v153_v10 = vlaneseq  ;;  %s318_s1 = inlined_call_operand.vmem [shape: bf16[128,128], index: 1, kind: input, shape index: {}]   ;;  %s319_s0 = inlined_call_operand.vmem [shape: bf16[16,128], index: 0, kind: input, shape index: {}]   ;;  %s320_s2 = inlined_call_operand.vmem [shape: bf16[16,128], index: 2, kind: input, shape index: {}]   ;;  %s321_s3 = inlined_call_operand.vmem [shape: f32[16,128], index: 3, kind: output, shape index: {0}]   ;;  %s322_s4 = inlined_call_operand.vmem [shape: f32[16,128], index: 4, kind: output, shape index: {1}]  }
   0x1   :  { %210 = vmatprep.subr.bf16.mxu0 %v249_v0  ;;  %v232_v1 = vld [vmem:[%s318_s1 + $0x38] sm:$0xff]   ;;  %226 = vmatprep.mubr.msk.bf16.mxu0 %vm250_vm0, %v249_v0  ;;  %v233_v2 = vld [vmem:[%s318_s1 + $0x30] sm:$0xff]   ;;  %v234_v3 = vld [vmem:[%s318_s1 + $0x28] sm:$0xff]  }
   0x2   :  { %211 = vmatpush3.bf16.msra.mxu0 %v232_v1  ;;  %v235_v4 = vld [vmem:[%s318_s1 + $0x20] sm:$0xff]   ;;  %v236_v5 = vld [vmem:[%s318_s1 + $0x18] sm:$0xff]   ;;  %v237_v6 = vld [vmem:[%s318_s1 + $0x10] sm:$0xff]   ;;  %v154_v12 = vand.u32 127, %v153_v10 }
   0x3   :  { %212 = vmatprep.subr.bf16.mxu0 %v249_v0  ;;  %v238_v7 = vld [vmem:[%s318_s1 + $0x8] sm:$0xff]   ;;  %v239_v8 = vld [vmem:[%s318_s1] sm:$0xff]  }
   0x4   :  { %v240_v9 = vld [vmem:[%s319_s0] sm:$0xff]   ;;  %vm155_vm1 = vcmp.lt.s32.totalorder %v154_v12, 4 }
   0x5   :  { %v198_v11 = vld [vmem:[%s320_s2] sm:$0xff]  }
   0x6   :  { %213 = vmatpush3.bf16.msra.mxu0 %v233_v2  ;;  %v199_v13 = vunpack.c.l.bf16 %v198_v11  ;;  %v200_v16 = vunpack.c.h.bf16 %v198_v11 }
   0x7   :  { %214 = vmatprep.subr.bf16.mxu0 %v249_v0 }
   0xa   :  { %215 = vmatpush3.bf16.msra.mxu0 %v234_v3 }
   0xb   :  { %216 = vmatprep.subr.bf16.mxu0 %v249_v0 }
   0xe   :  { %217 = vmatpush3.bf16.msra.mxu0 %v235_v4 }
   0xf   :  { %218 = vmatprep.subr.bf16.mxu0 %v249_v0 }
  0x12   :  { %219 = vmatpush3.bf16.msra.mxu0 %v236_v5 }
  0x13   :  { %220 = vmatprep.subr.bf16.mxu0 %v249_v0 }
  0x16   :  { %221 = vmatpush3.bf16.msra.mxu0 %v237_v6 }
  0x17   :  { %222 = vmatprep.subr.bf16.mxu0 %v249_v0 }
  0x1a   :  { %223 = vmatpush3.bf16.msra.mxu0 %v238_v7 }
  0x1b   :  { %224 = vmatprep.subr.bf16.mxu0 %v249_v0 }
  0x1e   :  { %225 = vmatpush3.bf16.msra.mxu0 %v239_v8 }
  0x21   :  { %227 = vmatmul.mubr.bf16.vlgmr.msra.gmra.mxu0 %v240_v9 }
  0xe1   :  { %v135_v14 = vpop.f32.mrf.mxu0 }
  0xe2   :  { %v142_v15 = vadd.f32 %v199_v13, %v135_v14 }
  0xe3   :  { %v228_v17 = vpop.f32.mrf.mxu0 }
  0xe4   :  { %151 = vst [vmem:[%s321_s3] sm:$0xff] %v142_v15  ;;  %v156_v18 = vsel %vm155_vm1, %v142_v15, -1e+30 }
  0xe5   :  { %158 = vmax.xlane.f32.xlu0 %v156_v18  ;;  %v138_v19 = vpop.f32.mrf.mxu0 }
  0xe6   :  { %v143_v20 = vadd.f32 %v200_v16, %v138_v19 }
  0xe7   :  { %v229_v21 = vpop.f32.mrf.mxu0 }
  0xe8   :  { %152 = vst [vmem:[%s321_s3 + $0x8] sm:$0xff] %v143_v20  ;;  %v157_v22 = vsel %vm155_vm1, %v143_v20, -1e+30 }
  0xe9   :  { %160 = vmax.xlane.f32.xlu0 %v157_v22 }
 0x16e   :  { %v159_v23 = vpop.xlane.xlu0 %158 }
 0x16f   :  { %v162_v24 = vsub.f32 %v156_v18, %v159_v23 }
 0x171   :  { %v164_v25 = vmul.f32 1.442695, %v162_v24 }
 0x172   :  { %v161_v26 = vpop.xlane.xlu0 %160 }
 0x173   :  { %v163_v27 = vsub.f32 %v157_v22, %v161_v26  ;;  %241 = vpow2.f32 %v164_v25 }
 0x175   :  { %v166_v28 = vmul.f32 1.442695, %v163_v27 }
 0x177   :  { %243 = vpow2.f32 %v166_v28 }
 0x180   :  { %v242_v29 = vpop.eup %241 }
 0x181   :  { %168 = vadd.xlane.f32.xlu1 %v242_v29 }
 0x184   :  { %v244_v30 = vpop.eup %243 }
 0x185   :  { %170 = vadd.xlane.f32.xlu1 %v244_v30 }
 0x20a   :  { %v169_v31 = vpop.xlane.xlu1 %168 }
 0x20b   :  { %245 = vlog2.f32 %v169_v31 }
 0x20e   :  { %v171_v32 = vpop.xlane.xlu1 %170 }
 0x20f   :  { %247 = vlog2.f32 %v171_v32 }
 0x218   :  { %v246_v33 = vpop.eup %245 }
 0x219   :  { %v173_v34 = vmul.f32 0.6931472, %v246_v33 }
 0x21b   :  { %v176_v35 = vsub.f32 %v162_v24, %v173_v34 }
 0x21c   :  { %v248_v36 = vpop.eup %247 }
 0x21d   :  { %178 = vst [vmem:[%s322_s4] sm:$0xff] %v176_v35  ;;  %v175_v37 = vmul.f32 0.6931472, %v248_v36 }
 0x21f   :  { %v177_v38 = vsub.f32 %v163_v27, %v175_v37 }
 0x221   :  { %179 = vst [vmem:[%s322_s4 + $0x8] sm:$0xff] %v177_v38 }

</bundles_post_ra>
